<compile_context>
chip_gen: v6e
topology: v6e:2x2x1
jax: 0.10.0
libtpu: 0.0.40
codegen_flags: <defaults>
</compile_context>

<pallas_src>
import functools

import jax
import jax.numpy as jnp
from jax.experimental import pallas as pl
from jax.experimental.pallas import tpu as pltpu

C_IN = 4            # input channels
HIDDEN = 32         # backbone hidden width
N_CLASSES = 8       # number of object classes
HEAD_PAD = 16       # fused head rows: [0:4] = box deltas, [8:16] = class logits, [4:8] pad
OUT_ROWS = 8        # packed output: 0-3 boxes, 4 score, 5 class (bitcast), 6-7 pad
MAX_TILE_N = 2048   # cap on lanes per grid step for real detection resolutions


def _choose_tile_n(n, w):
    """Largest tile that divides N, is lane-aligned (mult of 128) and a multiple of W
    (keeps anchor math exact), capped at MAX_TILE_N, preferring >=2 grid steps so the
    spatial axis can be sharded across v7x's two TensorCores."""
    cands = [t for t in range(128, min(n, MAX_TILE_N) + 1, 128)
             if n % t == 0 and t % w == 0]
    if not cands:
        return n
    two_step = [t for t in cands if n // t >= 2]
    return max(two_step) if two_step else max(cands)


def det_head_kernel(y_step, x_ref, w1t_ref, b1t_ref, whead_ref, bhead_ref,
                    abase_ref, out_ref):
    # Spatial-on-lanes layout: everything is [*, TILE_N].
    x = x_ref[...]                                                    # [C_IN, T]

    # backbone: 1x1 conv as matmul + ReLU
    h = jnp.dot(w1t_ref[...], x, preferred_element_type=jnp.float32) + b1t_ref[...]
    h = jnp.maximum(h, 0.0)                                           # [HIDDEN, T]

    # fused box/class head: one MXU push; rows 0:4 = deltas, rows 8:16 = logits
    out = jnp.dot(whead_ref[...], h,
                  preferred_element_type=jnp.float32) + bhead_ref[...]    # [16, T]
    deltas = out[0:4, :]                                              # [4, T]
    logits = out[8:8 + N_CLASSES, :]                                  # [K, T]

    # score = max softmax prob = 1 / sum(exp(logits - max))  (exact identity; EUP recip)
    m = jnp.max(logits, axis=0, keepdims=True)                        # [1, T]
    s = jnp.sum(jnp.exp(logits - m), axis=0, keepdims=True)           # [1, T]
    scores = pl.reciprocal(s, approx=True)    # ~1e-3 rel err; approx=False if thresholds tight

    # argmax over classes (lowest index wins ties, matching torch.argmax)
    cls_idx = jax.lax.broadcasted_iota(jnp.int32, logits.shape, 0)
    classes = jnp.min(jnp.where(logits == m, cls_idx, jnp.int32(N_CLASSES)),
                      axis=0, keepdims=True)                          # [1, T] int32

    # anchors = resident base tile + per-step y offset (exact since TILE_N % W == 0)
    tn = deltas.shape[1]
    pid_y = pl.program_id(0).astype(jnp.float32) * jnp.float32(y_step)
    row = jax.lax.broadcasted_iota(jnp.int32, (4, tn), 0)
    y_off = jnp.where((row & 1) == 1, pid_y, jnp.float32(0.0))        # rows 1,3 are y coords
    boxes = abase_ref[...] + y_off + deltas                           # [4, T]

    # single (8, T) packed, unmasked full-vreg store -> one output DMA per step
    out_ref[...] = jnp.concatenate(
        [boxes, scores, pltpu.bitcast(classes, jnp.float32),
         jnp.zeros((2, tn), jnp.float32)], axis=0)


def make_params(key):
    k1, k2, k3, k4, k5, k6 = jax.random.split(key, 6)
    w1 = 0.1 * jax.random.normal(k1, (C_IN, HIDDEN), jnp.float32)
    b1 = 0.1 * jax.random.normal(k2, (1, HIDDEN), jnp.float32)
    wbox = 0.1 * jax.random.normal(k3, (HIDDEN, 4), jnp.float32)
    bbox = 0.1 * jax.random.normal(k4, (1, 4), jnp.float32)
    wcls = 0.1 * jax.random.normal(k5, (HIDDEN, N_CLASSES), jnp.float32)
    bcls = 0.1 * jax.random.normal(k6, (1, N_CLASSES), jnp.float32)
    return dict(w1=w1, b1=b1, wbox=wbox, bbox=bbox, wcls=wcls, bcls=bcls)


def model_wrapper_forward(images, height, width, params):
    """Equivalent of ModelWrapper.forward: returns (pred_boxes, scores, pred_classes)
    for the first image of the batch (ModelWrapper indexes the net output with [0])."""
    B, C, H, W = images.shape
    assert C == C_IN
    N = H * W
    TILE_N = _choose_tile_n(N, W)
    assert N % TILE_N == 0 and TILE_N % W == 0
    assert TILE_N % 128 == 0 or TILE_N == N

    # Only image 0 is ever returned -> skip the rest of the batch entirely.
    # NCHW already has spatial last, so this reshape is free (no transpose pass).
    x = images[0].reshape(C, N)                                       # [C_IN, N]

    sy = float(height) / H
    sx = float(width) / W

    # Pack weights for the transposed (spatial-on-lanes) orientation.
    w1t = params["w1"].T                                              # [HIDDEN, C_IN]
    b1t = params["b1"].reshape(HIDDEN, 1)                             # [HIDDEN, 1]
    whead = jnp.zeros((HEAD_PAD, HIDDEN), jnp.float32)
    whead = whead.at[0:4].set(params["wbox"].T)
    whead = whead.at[8:8 + N_CLASSES].set(params["wcls"].T)           # [16, HIDDEN]
    bhead = jnp.zeros((HEAD_PAD, 1), jnp.float32)
    bhead = bhead.at[0:4].set(params["bbox"].reshape(4, 1))
    bhead = bhead.at[8:8 + N_CLASSES].set(params["bcls"].reshape(N_CLASSES, 1))

    # Resident anchor-base tile (grid step 0): rows = (x1, y1, x2, y2) per lane.
    lanes = jnp.arange(TILE_N)
    xx = (lanes % W).astype(jnp.float32)
    yy = (lanes // W).astype(jnp.float32)
    abase = jnp.stack([xx * sx, yy * sy, (xx + 1.0) * sx, (yy + 1.0) * sy],
                      axis=0)                                         # [4, TILE_N]
    y_step = (TILE_N // W) * sy                                       # per-step y offset

    grid = (N // TILE_N,)
    full = lambda i: (0, 0)
    kernel = functools.partial(det_head_kernel, y_step)

    packed = pl.pallas_call(
        kernel,
        out_shape=jax.ShapeDtypeStruct((OUT_ROWS, N), jnp.float32),
        grid_spec=pltpu.PrefetchScalarGridSpec(
            num_scalar_prefetch=0,
            grid=grid,
            in_specs=[
                pl.BlockSpec((C_IN, TILE_N), lambda i: (0, i)),       # x      (lane-dense)
                pl.BlockSpec((HIDDEN, C_IN), full),                   # w1t    (resident)
                pl.BlockSpec((HIDDEN, 1), full),                      # b1t    (resident)
                pl.BlockSpec((HEAD_PAD, HIDDEN), full),               # whead  (resident)
                pl.BlockSpec((HEAD_PAD, 1), full),                    # bhead  (resident)
                pl.BlockSpec((4, TILE_N), full),                      # abase  (resident)
            ],
            out_specs=pl.BlockSpec((OUT_ROWS, TILE_N), lambda i: (0, i)),  # packed slab
        ),
        compiler_params=pltpu.CompilerParams(
            dimension_semantics=("parallel",)),
    )(x, w1t, b1t, whead, bhead, abase)

    # One transpose of the packed slab, then slices (no per-output transpose passes).
    packed_nt = packed.T                                              # [N, 8]
    pred_boxes = packed_nt[:, 0:4]                                    # [H*W, 4]
    pred_scores = packed_nt[:, 4]                                     # [H*W]
    pred_classes = jax.lax.bitcast_convert_type(packed_nt[:, 5], jnp.int32)  # [H*W]
    # TODO(synk): detectron2 post-processing (score thresholding / NMS) has no
    # clean single-kernel Pallas equivalent and is omitted; all locations are
    # returned as instances.
    return pred_boxes, pred_scores, pred_classes


def reference_forward(images, height, width, params):
    """Pure-JAX reference of the same synthetic detection head (image 0 only)."""
    B, C, H, W = images.shape
    x = jnp.transpose(images[0], (1, 2, 0)).reshape(H * W, C)         # [N, C]
    h = jnp.maximum(x @ params["w1"] + params["b1"], 0.0)
    deltas = h @ params["wbox"] + params["bbox"]
    logits = h @ params["wcls"] + params["bcls"]
    probs = jax.nn.softmax(logits, axis=-1)
    scores = jnp.max(probs, axis=-1)
    classes = jnp.argmax(logits, axis=-1).astype(jnp.int32)
    sy = float(height) / H
    sx = float(width) / W
    ys = jnp.arange(H, dtype=jnp.float32)
    xs = jnp.arange(W, dtype=jnp.float32)
    yy, xx = jnp.meshgrid(ys, xs, indexing="ij")
    anchors = jnp.stack([xx * sx, yy * sy, (xx + 1.0) * sx, (yy + 1.0) * sy],
                        axis=-1).reshape(H * W, 4)
    return anchors + deltas, scores, classes


if __name__ == "__main__":
    key = jax.random.PRNGKey(0)
    k_img, k_par = jax.random.split(key)

    B, H, W = 2, 16, 16
    images = jax.random.normal(k_img, (B, C_IN, H, W), jnp.float32)   # NCHW, like PyTorch
    params = make_params(k_par)

    height, width = 64, 64   # ModelWrapper's (height, width) metadata
    boxes, scores, classes = model_wrapper_forward(images, height, width, params)
    jax.block_until_ready((boxes, scores, classes))

    assert boxes.shape == (H * W, 4) and boxes.dtype == jnp.float32
    assert scores.shape == (H * W,) and scores.dtype == jnp.float32
    assert classes.shape == (H * W,) and classes.dtype == jnp.int32

    ref_boxes, ref_scores, ref_classes = reference_forward(images, height, width, params)
    assert jnp.allclose(boxes, ref_boxes, rtol=1e-3, atol=1e-3)
    assert jnp.allclose(scores, ref_scores, rtol=1e-2, atol=1e-3)
    assert jnp.array_equal(classes, ref_classes)

    print("KERNEL_OK")
</pallas_src>

<mosaic_0001>
module attributes {stable_mosaic.version = 11 : i64} {
  func.func @det_head_kernel(%arg0: i32, %arg1: memref<4x128xf32, #tpu.memory_space<vmem>>, %arg2: memref<32x4xf32, #tpu.memory_space<vmem>>, %arg3: memref<32x1xf32, #tpu.memory_space<vmem>>, %arg4: memref<16x32xf32, #tpu.memory_space<vmem>>, %arg5: memref<16x1xf32, #tpu.memory_space<vmem>>, %arg6: memref<4x128xf32, #tpu.memory_space<vmem>>, %arg7: memref<8x128xf32, #tpu.memory_space<vmem>>) attributes {dimension_semantics = [#tpu.dimension_semantics<parallel>], iteration_bounds = array<i64: 2>, scalar_prefetch = 0 : i64, scratch_operands = 0 : i64, tpu.core_type = #tpu.core_type<tc>, window_params = [{transform_indices = @transform_0, window_bounds = array<i64: 4, 128>}, {pipeline_mode = #tpu.pipeline_mode<synchronous>, transform_indices = @transform_1, window_bounds = array<i64: 32, 4>}, {pipeline_mode = #tpu.pipeline_mode<synchronous>, transform_indices = @transform_2, window_bounds = array<i64: 32, 1>}, {pipeline_mode = #tpu.pipeline_mode<synchronous>, transform_indices = @transform_3, window_bounds = array<i64: 16, 32>}, {pipeline_mode = #tpu.pipeline_mode<synchronous>, transform_indices = @transform_4, window_bounds = array<i64: 16, 1>}, {pipeline_mode = #tpu.pipeline_mode<synchronous>, transform_indices = @transform_5, window_bounds = array<i64: 4, 128>}, {transform_indices = @transform_6, window_bounds = array<i64: 8, 128>}]} {
    %c0 = arith.constant 0 : index
    %c0_0 = arith.constant 0 : index
    %0 = vector.load %arg1[%c0, %c0_0] : memref<4x128xf32, #tpu.memory_space<vmem>>, vector<4x128xf32>
    %c0_1 = arith.constant 0 : index
    %c0_2 = arith.constant 0 : index
    %1 = vector.load %arg2[%c0_1, %c0_2] : memref<32x4xf32, #tpu.memory_space<vmem>>, vector<32x4xf32>
    %cst = arith.constant dense<0.000000e+00> : vector<32x128xf32>
    %2 = tpu.matmul %1, %0, %cst {dimension_numbers = #tpu.dot_dimension_numbers<[1], [0], [0], [1], [0, 0, 1, 1], [], []>} : vector<32x4xf32>, vector<4x128xf32>, vector<32x128xf32> -> vector<32x128xf32>
    %c0_3 = arith.constant 0 : index
    %c0_4 = arith.constant 0 : index
    %3 = vector.load %arg3[%c0_3, %c0_4] : memref<32x1xf32, #tpu.memory_space<vmem>>, vector<32x1xf32>
    %4 = vector.broadcast %3 : vector<32x1xf32> to vector<32x128xf32>
    %5 = arith.addf %2, %4 : vector<32x128xf32>
    %cst_5 = arith.constant 0.000000e+00 : f32
    %6 = vector.broadcast %cst_5 : f32 to vector<32x128xf32>
    %7 = arith.maximumf %5, %6 : vector<32x128xf32>
    %c0_6 = arith.constant 0 : index
    %c0_7 = arith.constant 0 : index
    %8 = vector.load %arg4[%c0_6, %c0_7] : memref<16x32xf32, #tpu.memory_space<vmem>>, vector<16x32xf32>
    %cst_8 = arith.constant dense<0.000000e+00> : vector<16x128xf32>
    %9 = tpu.matmul %8, %7, %cst_8 {dimension_numbers = #tpu.dot_dimension_numbers<[1], [0], [0], [1], [0, 0, 1, 1], [], []>} : vector<16x32xf32>, vector<32x128xf32>, vector<16x128xf32> -> vector<16x128xf32>
    %c0_9 = arith.constant 0 : index
    %c0_10 = arith.constant 0 : index
    %10 = vector.load %arg5[%c0_9, %c0_10] : memref<16x1xf32, #tpu.memory_space<vmem>>, vector<16x1xf32>
    %11 = vector.broadcast %10 : vector<16x1xf32> to vector<16x128xf32>
    %12 = arith.addf %9, %11 : vector<16x128xf32>
    %13 = vector.extract_strided_slice %12 {offsets = [0, 0], sizes = [4, 128], strides = [1, 1]} : vector<16x128xf32> to vector<4x128xf32>
    %14 = vector.extract_strided_slice %12 {offsets = [8, 0], sizes = [8, 128], strides = [1, 1]} : vector<16x128xf32> to vector<8x128xf32>
    %cst_11 = arith.constant dense<0xFF800000> : vector<128xf32>
    %15 = vector.multi_reduction <maximumf>, %14, %cst_11 [0] : vector<8x128xf32> to vector<128xf32>
    %16 = vector.shape_cast %15 : vector<128xf32> to vector<1x128xf32>
    %17 = vector.broadcast %16 : vector<1x128xf32> to vector<8x128xf32>
    %18 = arith.subf %14, %17 : vector<8x128xf32>
    %19 = math.exp %18 : vector<8x128xf32>
    %cst_12 = arith.constant dense<0.000000e+00> : vector<128xf32>
    %20 = vector.multi_reduction <add>, %19, %cst_12 [0] : vector<8x128xf32> to vector<128xf32>
    %21 = vector.shape_cast %20 : vector<128xf32> to vector<1x128xf32>
    %22 = tpu.reciprocal %21 {approx = true} : vector<1x128xf32> -> vector<1x128xf32>
    %23 = tpu.iota {dimensions = array<i32: 0>} : vector<8x128xi32>
    %24 = vector.broadcast %16 : vector<1x128xf32> to vector<8x128xf32>
    %25 = arith.cmpf oeq, %14, %24 : vector<8x128xf32>
    %c8_i32 = arith.constant 8 : i32
    %26 = vector.broadcast %c8_i32 : i32 to vector<8x128xi32>
    %27 = arith.select %25, %23, %26 : vector<8x128xi1>, vector<8x128xi32>
    %cst_13 = arith.constant dense<2147483647> : vector<128xi32>
    %28 = vector.multi_reduction <minsi>, %27, %cst_13 [0] : vector<8x128xi32> to vector<128xi32>
    %29 = vector.shape_cast %28 : vector<128xi32> to vector<1x128xi32>
    %30 = arith.sitofp %arg0 : i32 to f32
    %cst_14 = arith.constant 3.200000e+01 : f32
    %31 = arith.mulf %30, %cst_14 : f32
    %32 = tpu.iota {dimensions = array<i32: 0>} : vector<4x128xi32>
    %c1_i32 = arith.constant 1 : i32
    %33 = vector.broadcast %c1_i32 : i32 to vector<4x128xi32>
    %34 = arith.andi %32, %33 : vector<4x128xi32>
    %c1_i32_15 = arith.constant 1 : i32
    %35 = vector.broadcast %c1_i32_15 : i32 to vector<4x128xi32>
    %36 = arith.cmpi eq, %34, %35 : vector<4x128xi32>
    %cst_16 = arith.constant 0.000000e+00 : f32
    %37 = vector.broadcast %31 : f32 to vector<4x128xf32>
    %38 = vector.broadcast %cst_16 : f32 to vector<4x128xf32>
    %39 = arith.select %36, %37, %38 : vector<4x128xi1>, vector<4x128xf32>
    %c0_17 = arith.constant 0 : index
    %c0_18 = arith.constant 0 : index
    %40 = vector.load %arg6[%c0_17, %c0_18] : memref<4x128xf32, #tpu.memory_space<vmem>>, vector<4x128xf32>
    %41 = arith.addf %40, %39 : vector<4x128xf32>
    %42 = arith.addf %41, %13 : vector<4x128xf32>
    %43 = tpu.bitcast %29 : vector<1x128xi32> -> vector<1x128xf32>
    %cst_19 = arith.constant 0.000000e+00 : f32
    %44 = vector.broadcast %cst_19 : f32 to vector<2x128xf32>
    %45 = tpu.concatenate %42, %22, %43, %44 in 0 : vector<4x128xf32>, vector<1x128xf32>, vector<1x128xf32>, vector<2x128xf32> -> vector<8x128xf32>
    %c0_20 = arith.constant 0 : index
    %c0_21 = arith.constant 0 : index
    %46 = vector.load %arg7[%c0_20, %c0_21] : memref<8x128xf32, #tpu.memory_space<vmem>>, vector<8x128xf32>
    tpu.vector_store %arg7[%c0_20, %c0_21], %45 {strides = array<i32>} : memref<8x128xf32, #tpu.memory_space<vmem>>, vector<8x128xf32>,
    return
  }
  func.func @transform_0(%arg0: i32) -> (i32, i32) {
    %c0_i32 = arith.constant 0 : i32
    %c0_i32_0 = arith.constant 0 : i32
    return %c0_i32, %arg0 : i32, i32
  }
  func.func @transform_1(%arg0: i32) -> (i32, i32) {
    %c0_i32 = arith.constant 0 : i32
    %c0_i32_0 = arith.constant 0 : i32
    %c0_i32_1 = arith.constant 0 : i32
    return %c0_i32, %c0_i32_0 : i32, i32
  }
  func.func @transform_2(%arg0: i32) -> (i32, i32) {
    %c0_i32 = arith.constant 0 : i32
    %c0_i32_0 = arith.constant 0 : i32
    %c0_i32_1 = arith.constant 0 : i32
    return %c0_i32, %c0_i32_0 : i32, i32
  }
  func.func @transform_3(%arg0: i32) -> (i32, i32) {
    %c0_i32 = arith.constant 0 : i32
    %c0_i32_0 = arith.constant 0 : i32
    %c0_i32_1 = arith.constant 0 : i32
    return %c0_i32, %c0_i32_0 : i32, i32
  }
  func.func @transform_4(%arg0: i32) -> (i32, i32) {
    %c0_i32 = arith.constant 0 : i32
    %c0_i32_0 = arith.constant 0 : i32
    %c0_i32_1 = arith.constant 0 : i32
    return %c0_i32, %c0_i32_0 : i32, i32
  }
  func.func @transform_5(%arg0: i32) -> (i32, i32) {
    %c0_i32 = arith.constant 0 : i32
    %c0_i32_0 = arith.constant 0 : i32
    %c0_i32_1 = arith.constant 0 : i32
    return %c0_i32, %c0_i32_0 : i32, i32
  }
  func.func @transform_6(%arg0: i32) -> (i32, i32) {
    %c0_i32 = arith.constant 0 : i32
    %c0_i32_0 = arith.constant 0 : i32
    return %c0_i32, %arg0 : i32, i32
  }
}

</mosaic_0001>

<bundles_post_ra>
// kernel: tpu_custom_call.1
= control target key start
LH: loop header
LB: loop body
LE: loop exit
PB: predicated region body
PF: predicated region fallthrough
CT: control target
= control target key end

     0   :  { %11 = vsyncpa [#allocation3], 0  ;;  %s930_s0 = inlined_call_operand.vmem [shape: f32[4,256], index: 0, kind: input, shape index: {}]   ;;  %s931_s1 = inlined_call_operand.vmem [shape: f32[32,4], index: 1, kind: input, shape index: {}]   ;;  %s932_s2 = inlined_call_operand.vmem [shape: f32[32,1], index: 2, kind: input, shape index: {}]   ;;  %s933_s3 = inlined_call_operand.vmem [shape: f32[16,32], index: 3, kind: input, shape index: {}]   ;;  %s934_s4 = inlined_call_operand.vmem [shape: f32[16,1], index: 4, kind: input, shape index: {}]   ;;  %s935_s5 = inlined_call_operand.vmem [shape: f32[4,128], index: 5, kind: input, shape index: {}]   ;;  %s936_s6 = inlined_call_operand.hbm [shape: f32[8,256], index: 6, kind: output, shape index: {}]  }
   0x1   :  { %13 = vsyncpa [#allocation3 + $0x1], 0  ;;  %s788_s21 = smov 0   ;;  %s790_s22 = smov 0  }
   0x2   :  { %s792_s23 = smov 0   ;;  %s794_s24 = smov 0  }
   0x3 LB: > { %s809_s25 = sadd.s32 4294967295, %s749_s24   ;;  %s596_s26 = sadd.s32 4294967294, %s749_s24   ;;  %s749_s24 = sphi %s794_s24, %s942_s24   ;;  %s745_s23 = sphi %s792_s23, %s941_s23   ;;  %s741_s22 = sphi %s790_s22, %s940_s22   ;;  %s737_s21 = sphi %s788_s21, %s939_s21  }
   0x4   : > { %s813_s27 = sadd.s32 1, %s749_s24   ;;  %s157_s28 = sadd.s32 1, %s745_s23 }
   0x5   : > { %s154_s29 = ssub.s32 %s749_s24, %s813_s27  ;;  %p167_p0 = scmp.ne.s32.totalorder %s745_s23, %s741_s22 }
   0x6   : > { %p155_p1 = scmp.eq.s32.totalorder %s154_s29, 0  ;;  %p168_p2 = scmp.eq.s32.totalorder %s809_s25, 1 }
   0x7   : > { %p173_p3 = scmp.ne.s32.totalorder %s741_s22, %s737_s21  ;;  %p174_p4 = scmp.eq.s32.totalorder %s596_s26, 1 }
   0x8   : > { %s824_s30 = scalar_select %p155_p1, %s745_s23, %s157_s28  }
   0x9   : > { %p826_p5 = por %p168_p2, %p167_p0  ;;  %p830_p6 = por %p174_p4, %p173_p3 }
   0xa   : > { %p599_p7 = scmp.ge.s32.totalorder %s749_s24, 1  ;;  %p214_p8 = scmp.lt.s32.totalorder %s749_s24, 3 }
   0xc   : > { %p215_p9 = pnand %p599_p7, %p214_p8 }
   0xd   : > { %p243_p10 = scmp.lt.s32.totalorder (!%p215_p9), %s809_s25, 1  ;;  %s507_s29 = scvt.s32.f32 (!%p215_p9), %s809_s25 }
   0xe   : > { %218 = sbr.rel (%p215_p9) target bundleno = 502 (0x1f6), region = 44  ;;  %s240_s10 = sand.u32 (!%p215_p9), 1, %s741_s22  }
   0xf   : > { %s508_s9 = smul.f32 (!%p215_p9), 32.0, %s507_s29  ;;  %s610_s14 = sshll.u32 (!%p215_p9), %s809_s25, 7 }
  0x10   : > { %s895_s19 = scalar_lea.hbm (!%p215_p9), %s936_s6, %s610_s14  ;;  %s524_s20 = scalar_lea.sflag (!%p215_p9), [#allocation3], %s240_s10 }
  0x13   : > { %v248_v0 = vld [vmem:[%s931_s1] sm:$0xff]  ;;  %vm276_vm0 = vcmask 31744   ;;  %v255_v1 = vld [vmem:[%s932_s2 + $0x18] sm:$0xff]  ;;  %s244_s13 = scalar_select %p243_p10, %s809_s25, 1  ;;  %v751_v2 = vmov 0   ;;  %v253_v3 = vld [vmem:[%s932_s2 + $0x8] sm:$0xff]  ;;  %v494_v41 = vlaneseq  ;;  %v511_v55 = vstv %s508_s9 }
  0x14   : > { %626 = vmatprep.mubr.msk.f32.mxu0 %vm276_vm0, %v248_v0  ;;  %683 = vset.pattern.permute.xlu0 %v751_v2  ;;  %vm289_vm1 = vcmask 1043456   ;;  %v254_v4 = vld [vmem:[%s932_s2 + $0x10] sm:$0xff]  ;;  %v252_v5 = vld [vmem:[%s932_s2] sm:$0xff]  ;;  %v249_v7 = vld [vmem:[%s931_s1 + $0x8] sm:$0xff]  ;;  %vm396_vm2 = vcmask 261120   ;;  %vm518_vm8 = vcmask 1044480  }
  0x15   : > { %684 = vset.pattern.permute.xlu1 %v751_v2  ;;  %273 = vperm.xlu0 %683, %v255_v1   ;;  %s601_s16 = sshll.u32 %s244_s13, 2  ;;  %v250_v8 = vld [vmem:[%s931_s1 + $0x10] sm:$0xff]  ;;  %v385_v9 = vld [vmem:[%s934_s4 + $0x8] sm:$0xff]  ;;  %v384_v10 = vld [vmem:[%s934_s4] sm:$0xff]  ;;  %v495_v42 = vshrl.u32 %v494_v41, 7  ;;  %s600_s13 = sshll.u32 %s240_s10, 3 }
  0x16   : > { %263 = vperm.xlu1 %684, %v253_v3   ;;  %s246_s26 = scalar_lea.vmem %s930_s0, %s601_s16  ;;  %v251_v11 = vld [vmem:[%s931_s1 + $0x18] sm:$0xff]  ;;  %v382_v12 = vld [vmem:[%s933_s3] sm:$0xff]  ;;  %v383_v29 = vld [vmem:[%s933_s3 + $0x8] sm:$0xff]  ;;  %s242_s15 = scalar_lea.vmem [#allocation2], %s600_s13  ;;  %vm520_vm9 = vcmask 1045504  }
  0x17   : > { %v247_v6 = vld [vmem:[%s246_s26] sm:$0xf]  ;;  %640 = vmatprep.mubr.msk.f32.mxu1 %vm396_vm2, %v382_v12  ;;  %v509_v54 = vand.u32 1, %v495_v42  ;;  %s537_s16 = sshll.u32 %s242_s15, 4  ;;  %s752_s25 = smov [#allocation2]   ;;  %s538_s16 = int_to_ptr.vmem [resolvable:$true] %s537_s16 }
  0x18   : > { %624 = vmatprep.subr.msk.mxu0 %vm289_vm1, %v247_v6  ;;  %v513_v59 = vld [vmem:[%s935_s5] sm:$0xf]  ;;  %s689_s26 = scalar_lea.vmem %s538_s16, 128  ;;  %s693_s28 = sshll.u32 %s752_s25, 4  ;;  %s694_s28 = int_to_ptr.vmem [resolvable:$false] %s693_s28 }
  0x19   : > { %268 = vperm.xlu0 %683, %v254_v4   ;;  %625 = vmatpush3.msk.msra.mxu0 %vm289_vm1, %v247_v6  ;;  %vm510_vm6 = vcmp.eq.s32.totalorder %v509_v54, 1  ;;  %p690_p11 = scmp.ne.s32.totalorder %s538_s16, %s689_s26  ;;  %s695_s29 = scalar_lea.vmem %s694_s28, 256 }
  0x1a   : > { %258 = vperm.xlu1 %684, %v252_v5   ;;  %627 = vmatmul.mubr.msk.f32.vlgmr.msra.gmra.mxu0 %vm276_vm0, %v249_v7  ;;  %v512_v58 = vsel %vm510_vm6, %v511_v55, 0.0  ;;  %p696_p0 = scmp.lt.s32.totalorder %s538_s16, %s694_s28  ;;  %p697_p1 = scmp.lt.s32.totalorder %s695_s29, %s689_s26 }
  0x1b   : > { %629 = vmatprep.mubr.msk.f32.mxu0 %vm276_vm0, %v250_v8  ;;  %v514_v63 = vadd.f32 %v513_v59, %v512_v58  ;;  %p691_p12 = pnand %p690_p11, %p826_p5 }
  0x1c   : > { %p698_p2 = por %p697_p1, %p696_p0 }
  0x1d   : > { %393 = vperm.xlu0 %683, %v385_v9   ;;  %p692_p13 = pneg %p691_p12 }
  0x1e   : > { %388 = vperm.xlu1 %684, %v384_v10   ;;  %630 = vmatmul.mubr.msk.f32.gmra.mxu0 %vm276_vm0, %v251_v11 }
  0x1f   : > { %p699_p3 = pnand %p698_p2, %p692_p13 }
  0x90   : > { %v274_v13 = vpop.permute.xlu0 %273 }
  0x91   : > { %v264_v14 = vpop.permute.xlu1 %263 }
  0x94   : > { %v269_v18 = vpop.permute.xlu0 %268 }
  0x95   : > { %v259_v20 = vpop.permute.xlu1 %258 }
  0x98   : > { %v394_v30 = vpop.permute.xlu0 %393 }
  0x99   : > { %v389_v60 = vpop.permute.xlu1 %388 }
  0xda   : > { %v628_v15 = vpop.f32.mrf.mxu0 }
  0xdb   : > { %v365_v22 = vadd.f32 %v628_v15, %v264_v14 }
  0xdc   : > { %v359_v16 = vpop.f32.mrf.mxu0 }
  0xdd   : > { %v360_v25 = vadd.f32 %v359_v16, %v259_v20  ;;  %v379_v27 = vmax.f32 %v365_v22, 0.0 }
  0xde   : > { %v631_v17 = vpop.f32.mrf.mxu0 }
  0xdf   : > { %v375_v19 = vadd.f32 %v631_v17, %v274_v13  ;;  %v378_v28 = vmax.f32 %v360_v25, 0.0 }
  0xe0   : > { %v369_v21 = vpop.f32.mrf.mxu0 }
  0xe1   : > { %v381_v23 = vmax.f32 %v375_v19, 0.0  ;;  %v370_v24 = vadd.f32 %v369_v21, %v269_v18 }
  0xe3   : > { %v380_v26 = vmax.f32 %v370_v24, 0.0  ;;  %632 = vmatprep.subr.mxu1 %v381_v23 }
  0xe4   : > { %633 = vmatpush3.msra.mxu1 %v381_v23 }
  0xe5   : > { %634 = vmatprep.subr.mxu1 %v380_v26 }
  0xe6   : > { %635 = vmatpush3.msra.mxu1 %v380_v26 }
  0xe7   : > { %636 = vmatprep.subr.mxu1 %v379_v27 }
  0xe8   : > { %637 = vmatpush3.msra.mxu1 %v379_v27 }
  0xe9   : > { %638 = vmatprep.subr.mxu1 %v378_v28 }
  0xea   : > { %639 = vmatpush3.msra.mxu1 %v378_v28 }
  0xeb   : > { %641 = vmatmul.mubr.msk.f32.vlgmr.msra.gmra.mxu1 %vm396_vm2, %v383_v29 }
 0x1ab   : > { %v642_v31 = vpop.f32.mrf.mxu1 }
 0x1ac   : > { %v475_v32 = vadd.f32 %v642_v31, %v394_v30 }
 0x1ad   : > { %v469_v57 = vpop.f32.mrf.mxu1 }
 0x1ae   : > { %v478_v33 = vrot.slane %v475_v32, 4  ;;  %v470_v62 = vadd.f32 %v469_v57, %v389_v60 }
 0x1b0   : > { %v479_v34 = vmax.f32 %v475_v32, %v478_v33  ;;  %v515_v0 = vadd.f32 %v514_v63, %v470_v62 }
 0x1b2   : > { %v480_v35 = vrot.slane %v479_v34, 2 }
 0x1b4   : > { %v481_v36 = vmax.f32 %v479_v34, %v480_v35 }
 0x1b6   : > { %v482_v37 = vrot.slane %v481_v36, 1 }
 0x1b8   : > { %v483_v38 = vmax.f32 %v481_v36, %v482_v37 }
 0x1ba   : > { %v484_v39 = vsub.f32 %v475_v32, %v483_v38  ;;  %vm496_vm3 = vcmp.eq.f32.partialorder %v475_v32, %v483_v38 }
 0x1bb   : > { %v497_v43 = vsel %vm496_vm3, %v495_v42, 8 }
 0x1bc   : > { %v485_v40 = vmul.f32 1.442695, %v484_v39  ;;  %v498_v45 = vrot.slane %v497_v43, 4 }
 0x1be   : > { %685 = vpow2.f32 %v485_v40  ;;  %vm499_vm4 = vcmp.lt.s32.totalorder %v497_v43, %v498_v45 }
 0x1bf   : > { %v500_v50 = vsel %vm499_vm4, %v497_v43, %v498_v45 }
 0x1c0   : > { %v501_v52 = vrot.slane %v500_v50, 2 }
 0x1c2   : > { %vm502_vm5 = vcmp.lt.s32.totalorder %v500_v50, %v501_v52 }
 0x1c3   : > { %v503_v56 = vsel %vm502_vm5, %v500_v50, %v501_v52 }
 0x1c4   : > { %v504_v61 = vrot.slane %v503_v56, 1 }
 0x1c6   : > { %vm505_vm7 = vcmp.lt.s32.totalorder %v503_v56, %v504_v61 }
 0x1c7   : > { %v506_v3 = vsel %vm505_vm7, %v503_v56, %v504_v61 }
 0x1cb   : > { %v686_v44 = vpop.eup %685 }
 0x1cc   : > { %v487_v46 = vrot.slane %v686_v44, 4 }
 0x1ce   : > { %v488_v47 = vadd.f32 %v686_v44, %v487_v46 }
 0x1d0   : > { %v489_v48 = vrot.slane %v488_v47, 2 }
 0x1d2   : > { %v490_v49 = vadd.f32 %v489_v48, %v488_v47 }
 0x1d4   : > { %v491_v51 = vrot.slane %v490_v49, 1 }
 0x1d6   : > { %v492_v53 = vadd.f32 %v491_v51, %v490_v49 }
 0x1d8   : > { %687 = vrcp.f32 %v492_v53 }
 0x1e5   : > { %v688_v1 = vpop.eup %687 }
 0x1e6   : > { %v517_v2 = vsel %vm289_vm1, %v515_v0, %v688_v1 }
 0x1e7   : > { %v519_v4 = vsel %vm518_vm8, %v517_v2, %v506_v3 }
 0x1e8   : > { %v521_v5 = vsel %vm520_vm9, %v519_v4, 0.0 }
 0x1e9   : > { %522 = vst [vmem:[%s242_s15] sm:$0xff] %v521_v5 }
 0x1ea   : > { %702 = shalt.err (!%p699_p3)
}
 0x1eb   : > { %s703_s9 = scalar_lea.hbm %s895_s19, 128  ;;  %s707_s12 = scalar_lea.hbm %s936_s6, 256 }
 0x1ec   : > { %p704_p4 = scmp.ne.s32.totalorder %s895_s19, %s703_s9  ;;  %p708_p9 = scmp.lt.s32.totalorder %s895_s19, %s936_s6 }
 0x1ed   : > { %p709_p10 = scmp.lt.s32.totalorder %s707_s12, %s703_s9 }
 0x1ee   : > { %p705_p7 = pnand %p704_p4, %p826_p5 }
 0x1ef   : > { %p710_p11 = por %p709_p10, %p708_p9 }
 0x1f0   : > { %p706_p8 = pneg %p705_p7 }
 0x1f2   : > { %p711_p12 = pnand %p710_p11, %p706_p8 }
 0x1f4   : > { %714 = shalt.err (!%p711_p12)
}
 0x1f5   : > { %643 = dma.vmem_to_hbm [thread:$0]  (%p826_p5), %s538_s16, 128, %s895_s19, %s524_s20  }
 0x1f6 PF: > { %p649_p13 = scmp.ge.s32.totalorder %s749_s24, 2  ;;  %s549_s15 = sand.u32 1, %s737_s21  }
 0x1f7   : > { %s550_s17 = scalar_lea.sflag [#allocation3], %s549_s15 }
 0x1f8   : > { %p646_p0 = pnand %p649_p13, %p830_p6 }
 0x1fa   : > { %p647_p1 = pneg %p646_p0 }
 0x1fc   : > { %732 = dma.done.wait (%p647_p1), %s550_s17, 128  }
 0x1fd   : > { %734 = vsyncadd (%p647_p1), %s550_s17, 4294967168  ;;  %p16_p2 = scmp.ge.s32.totalorder %s813_s27, 4   ;;  %s939_s21 = smov %s741_s22 }
 0x1fe   : > { %s940_s22 = smov %s745_s23  ;;  %s941_s23 = smov %s824_s30 }
 0x1ff   : > { %s942_s24 = smov %s813_s27  ;;  %18 = sbr.rel (!%p16_p2) target bundleno = 3 (0x3), region = 79 }
 0x204   :  { %555 = vsyncpa [#allocation3], 1 }
 0x205   :  { %557 = vsyncpa [#allocation3 + $0x1], 1 }

</bundles_post_ra>
